<compile_context>
chip_gen: v7x
topology: tpu7x:2x2x1
jax: 0.10.0
libtpu: 0.0.40
codegen_flags: <defaults>
</compile_context>

<pallas_src>
import functools

import jax
import jax.numpy as jnp
from jax import lax
from jax.experimental import pallas as pl
from jax.experimental.pallas import tpu as pltpu


def _n_pair_mc_loss_kernel(f_ref, fp_ref, lse_ref, m_sc, l_sc, t2_sc, *,
                           n_valid, block, padded, mm_dtype):
    i = pl.program_id(0)          # row block (parallel)
    j = pl.program_id(1)          # column block (reduction axis, innermost)

    @pl.when(j == 0)
    def _():
        m_sc[...] = jnp.full_like(m_sc, -jnp.inf)
        l_sc[...] = jnp.zeros_like(l_sc)

    # Raw logits tile: f_rows @ f_p_cols^T, contracting dim 1 of both operands
    # (no materialized transpose). Operands are cast to mm_dtype (bf16 by
    # default -> native MXU rate on v5e/v6e/v7x) with f32 accumulation.
    s = lax.dot_general(
        f_ref[...].astype(mm_dtype), fp_ref[...].astype(mm_dtype),
        dimension_numbers=(((1,), (1,)), ((), ())),
        preferred_element_type=jnp.float32)          # (block, block) f32

    if padded:
        # Padded (zero) f_p rows show up as columns here; they must not
        # contribute to the logsumexp. (Traced only when padding exists.)
        col = j * block + lax.broadcasted_iota(jnp.int32, s.shape, 1)
        s = jnp.where(col >= n_valid, -jnp.inf, s)

    def online_update(vals):
        m_prev = m_sc[...]
        m_new = jnp.maximum(m_prev, jnp.max(vals, axis=1, keepdims=True))
        l_sc[...] = (l_sc[...] * jnp.exp(m_prev - m_new)
                     + jnp.sum(jnp.exp(vals - m_new), axis=1, keepdims=True))
        m_sc[...] = m_new

    # term2 subtraction is deferred to the finalize step:
    #   logsumexp_c((term1 - t2) * (1 - eye)) == logsumexp_c(h) - t2
    # with h = term1 off-diagonal and h = t2 on the diagonal.
    # With symmetric tiles the global diagonal only lives in the i == j block,
    # so the iota/select work and the term2 reduction run on G of G^2 blocks.
    @pl.when(i == j)
    def _():
        t2 = jnp.sum(
            f_ref[...].astype(jnp.float32) * fp_ref[...].astype(jnp.float32),
            axis=1, keepdims=True)
        t2_sc[...] = t2
        row = lax.broadcasted_iota(jnp.int32, s.shape, 0)
        col = lax.broadcasted_iota(jnp.int32, s.shape, 1)
        online_update(jnp.where(row == col, t2, s))

    @pl.when(i != j)
    def _():
        online_update(s)

    @pl.when(j == pl.num_programs(1) - 1)
    def _():
        lse_ref[...] = m_sc[...] + jnp.log(l_sc[...]) - t2_sc[...]


def _choose_block(n, d, itemsize=4):
    """Symmetric row/col tile: VMEM-budgeted, lane/MXU friendly, minimal
    padding, and >= 2 row blocks when N allows (v7x megacore sharding)."""
    budget = 24 * 1024 * 1024        # stays inside v7x's 32 MiB scoped default
    n8 = ((n + 7) // 8) * 8
    for t in (512, 256, 128, 64, 32, 16, 8):
        if t > n8:
            continue                 # don't tile past the (padded) problem
        # 2 double-buffered (t, D) inputs + (t, t) f32 logits temporaries.
        vmem = 4 * t * d * itemsize + 2 * t * t * 4
        if vmem > budget:
            continue
        if n8 >= 16 and (n8 + t - 1) // t < 2:
            continue                 # prefer >= 2 row blocks for megacore
        return t
    return 8


def n_pair_mc_loss(f, f_p, *, block_n=None, mm_dtype=jnp.bfloat16):
    """N-pair multiclass loss. f, f_p: (N, D). Returns scalar float32 loss."""
    assert f.shape == f_p.shape and f.ndim == 2
    n, d = f.shape
    if block_n is None:
        block_n = _choose_block(n, d, jnp.dtype(f.dtype).itemsize)
    assert block_n % 8 == 0 or block_n == n, "block_n must be sublane aligned"

    g = pl.cdiv(n, block_n)
    n_pad = g * block_n
    padded = n_pad != n
    if padded:
        pad = n_pad - n
        f = jnp.pad(f, ((0, pad), (0, 0)))
        f_p = jnp.pad(f_p, ((0, pad), (0, 0)))

    kernel = functools.partial(
        _n_pair_mc_loss_kernel,
        n_valid=n, block=block_n, padded=padded, mm_dtype=mm_dtype)

    lse = pl.pallas_call(
        kernel,
        out_shape=jax.ShapeDtypeStruct((n_pad, 1), jnp.float32),
        grid_spec=pltpu.PrefetchScalarGridSpec(
            num_scalar_prefetch=0,
            grid=(g, g),
            in_specs=[
                pl.BlockSpec((block_n, d), lambda i, j: (i, 0)),  # f rows (resident over j)
                pl.BlockSpec((block_n, d), lambda i, j: (j, 0)),  # f_p cols (streamed)
            ],
            out_specs=pl.BlockSpec((block_n, 1), lambda i, j: (i, 0)),
            scratch_shapes=[
                pltpu.VMEM((block_n, 1), jnp.float32),  # running max m
                pltpu.VMEM((block_n, 1), jnp.float32),  # running sum l
                pltpu.VMEM((block_n, 1), jnp.float32),  # term2 cache
            ],
        ),
        compiler_params=pltpu.CompilerParams(
            dimension_semantics=("parallel", "arbitrary"),
            vmem_limit_bytes=48 * 1024 * 1024),
    )(f, f_p)

    # Mean over valid rows crosses the parallel row-block axis -> do it in JAX.
    return jnp.mean(lse[:n, 0])


def _reference(f, f_p):
    n = f.shape[0]
    term1 = f @ f_p.T
    term2 = jnp.sum(f * f_p, axis=1, keepdims=True)
    f_apn = (term1 - term2) * (1.0 - jnp.eye(n, dtype=f.dtype))
    return jnp.mean(jax.scipy.special.logsumexp(f_apn, axis=1))


if __name__ == "__main__":
    key = jax.random.PRNGKey(0)
    k1, k2, k3, k4, k5, k6 = jax.random.split(key, 6)

    # 1) Small single-block case, exact (f32 MXU) path, tight tolerance.
    N, D = 8, 32
    f = jax.random.normal(k1, (N, D), dtype=jnp.float32)
    f_p = jax.random.normal(k2, (N, D), dtype=jnp.float32)
    out = n_pair_mc_loss(f, f_p, mm_dtype=jnp.float32)
    jax.block_until_ready(out)
    ref = _reference(f, f_p)
    assert jnp.allclose(out, ref, rtol=1e-4, atol=1e-4), (out, ref)

    # 2) Tiled multi-block path (grid 4x4), default bf16 MXU feed (looser tol).
    N2, D2 = 32, 128
    f2 = jax.random.normal(k3, (N2, D2), dtype=jnp.float32)
    f2_p = jax.random.normal(k4, (N2, D2), dtype=jnp.float32)
    out2 = n_pair_mc_loss(f2, f2_p, block_n=8)
    jax.block_until_ready(out2)
    ref2 = _reference(f2, f2_p)
    assert jnp.allclose(out2, ref2, rtol=2e-2, atol=2e-2), (out2, ref2)

    # 3) Auto tile choice + pad-and-mask path (N not a multiple of the tile).
    N3, D3 = 20, 64
    f3 = jax.random.normal(k5, (N3, D3), dtype=jnp.float32)
    f3_p = jax.random.normal(k6, (N3, D3), dtype=jnp.float32)
    out3 = n_pair_mc_loss(f3, f3_p)
    jax.block_until_ready(out3)
    ref3 = _reference(f3, f3_p)
    assert jnp.allclose(out3, ref3, rtol=2e-2, atol=2e-2), (out3, ref3)

    print("KERNEL_OK")
</pallas_src>

<mosaic_0001>
module attributes {stable_mosaic.version = 11 : i64} {
  func.func @_n_pair_mc_loss_kernel(%arg0: i32, %arg1: i32, %arg2: memref<8x32xf32, #tpu.memory_space<vmem>>, %arg3: memref<8x32xf32, #tpu.memory_space<vmem>>, %arg4: memref<8x1xf32, #tpu.memory_space<vmem>>, %arg5: memref<8x1xf32, #tpu.memory_space<vmem>>, %arg6: memref<8x1xf32, #tpu.memory_space<vmem>>, %arg7: memref<8x1xf32, #tpu.memory_space<vmem>>) attributes {dimension_semantics = [#tpu.dimension_semantics<parallel>, #tpu.dimension_semantics<arbitrary>], iteration_bounds = array<i64: 1, 1>, scalar_prefetch = 0 : i64, scratch_operands = 3 : i64, tpu.core_type = #tpu.core_type<tc>, window_params = [{transform_indices = @transform_0, window_bounds = array<i64: 8, 32>}, {transform_indices = @transform_1, window_bounds = array<i64: 8, 32>}, {transform_indices = @transform_2, window_bounds = array<i64: 8, 1>}]} {
    %c0_i32 = arith.constant 0 : i32
    %0 = arith.cmpi eq, %arg1, %c0_i32 : i32
    %1 = arith.extui %0 : i1 to i32
    %c0_i32_0 = arith.constant 0 : i32
    %2 = arith.cmpi ne, %1, %c0_i32_0 : i32
    scf.if %2 {
      %cst_8 = arith.constant 0xFF800000 : f32
      %15 = vector.broadcast %cst_8 : f32 to vector<8x1xf32>
      %c0_9 = arith.constant 0 : index
      %c0_10 = arith.constant 0 : index
      %16 = vector.load %arg5[%c0_9, %c0_10] : memref<8x1xf32, #tpu.memory_space<vmem>>, vector<8x1xf32>
      tpu.vector_store %arg5[%c0_9, %c0_10], %15 {strides = array<i32>} : memref<8x1xf32, #tpu.memory_space<vmem>>, vector<8x1xf32>,
      %cst_11 = arith.constant 0.000000e+00 : f32
      %17 = vector.broadcast %cst_11 : f32 to vector<8x1xf32>
      %c0_12 = arith.constant 0 : index
      %c0_13 = arith.constant 0 : index
      %18 = vector.load %arg6[%c0_12, %c0_13] : memref<8x1xf32, #tpu.memory_space<vmem>>, vector<8x1xf32>
      tpu.vector_store %arg6[%c0_12, %c0_13], %17 {strides = array<i32>} : memref<8x1xf32, #tpu.memory_space<vmem>>, vector<8x1xf32>,
    } else {
    }
    %c0 = arith.constant 0 : index
    %c0_1 = arith.constant 0 : index
    %3 = vector.load %arg2[%c0, %c0_1] : memref<8x32xf32, #tpu.memory_space<vmem>>, vector<8x32xf32>
    %c0_2 = arith.constant 0 : index
    %c0_3 = arith.constant 0 : index
    %4 = vector.load %arg3[%c0_2, %c0_3] : memref<8x32xf32, #tpu.memory_space<vmem>>, vector<8x32xf32>
    %cst = arith.constant dense<0.000000e+00> : vector<8x8xf32>
    %5 = tpu.matmul %3, %4, %cst {dimension_numbers = #tpu.dot_dimension_numbers<[1], [1], [0], [0], [0, 0, 1, 0], [], []>} : vector<8x32xf32>, vector<8x32xf32>, vector<8x8xf32> -> vector<8x8xf32>
    %6 = arith.cmpi eq, %arg0, %arg1 : i32
    %7 = arith.extui %6 : i1 to i32
    %c0_i32_4 = arith.constant 0 : i32
    %8 = arith.cmpi ne, %7, %c0_i32_4 : i32
    scf.if %8 {
      %c0_8 = arith.constant 0 : index
      %c0_9 = arith.constant 0 : index
      %15 = vector.load %arg2[%c0_8, %c0_9] : memref<8x32xf32, #tpu.memory_space<vmem>>, vector<8x32xf32>
      %c0_10 = arith.constant 0 : index
      %c0_11 = arith.constant 0 : index
      %16 = vector.load %arg3[%c0_10, %c0_11] : memref<8x32xf32, #tpu.memory_space<vmem>>, vector<8x32xf32>
      %17 = arith.mulf %15, %16 : vector<8x32xf32>
      %cst_12 = arith.constant dense<0.000000e+00> : vector<8xf32>
      %18 = vector.multi_reduction <add>, %17, %cst_12 [1] : vector<8x32xf32> to vector<8xf32>
      %19 = vector.shape_cast %18 : vector<8xf32> to vector<8x1xf32>
      %c0_13 = arith.constant 0 : index
      %c0_14 = arith.constant 0 : index
      %20 = vector.load %arg7[%c0_13, %c0_14] : memref<8x1xf32, #tpu.memory_space<vmem>>, vector<8x1xf32>
      tpu.vector_store %arg7[%c0_13, %c0_14], %19 {strides = array<i32>} : memref<8x1xf32, #tpu.memory_space<vmem>>, vector<8x1xf32>,
      %21 = tpu.iota {dimensions = array<i32: 0>} : vector<8x8xi32>
      %22 = tpu.iota {dimensions = array<i32: 1>} : vector<8x8xi32>
      %23 = arith.cmpi eq, %21, %22 : vector<8x8xi32>
      %24 = vector.shape_cast %19 : vector<8x1xf32> to vector<8x1xf32>
      %25 = vector.broadcast %24 : vector<8x1xf32> to vector<8x8xf32>
      %26 = arith.select %23, %25, %5 : vector<8x8xi1>, vector<8x8xf32>
      %c0_15 = arith.constant 0 : index
      %c0_16 = arith.constant 0 : index
      %27 = vector.load %arg5[%c0_15, %c0_16] : memref<8x1xf32, #tpu.memory_space<vmem>>, vector<8x1xf32>
      %cst_17 = arith.constant dense<0xFF800000> : vector<8xf32>
      %28 = vector.multi_reduction <maximumf>, %26, %cst_17 [1] : vector<8x8xf32> to vector<8xf32>
      %29 = vector.shape_cast %28 : vector<8xf32> to vector<8x1xf32>
      %30 = arith.maximumf %27, %29 : vector<8x1xf32>
      %c0_18 = arith.constant 0 : index
      %c0_19 = arith.constant 0 : index
      %31 = vector.load %arg6[%c0_18, %c0_19] : memref<8x1xf32, #tpu.memory_space<vmem>>, vector<8x1xf32>
      %32 = arith.subf %27, %30 : vector<8x1xf32>
      %33 = math.exp %32 : vector<8x1xf32>
      %34 = arith.mulf %31, %33 : vector<8x1xf32>
      %35 = vector.broadcast %30 : vector<8x1xf32> to vector<8x8xf32>
      %36 = arith.subf %26, %35 : vector<8x8xf32>
      %37 = math.exp %36 : vector<8x8xf32>
      %cst_20 = arith.constant dense<0.000000e+00> : vector<8xf32>
      %38 = vector.multi_reduction <add>, %37, %cst_20 [1] : vector<8x8xf32> to vector<8xf32>
      %39 = vector.shape_cast %38 : vector<8xf32> to vector<8x1xf32>
      %40 = arith.addf %34, %39 : vector<8x1xf32>
      %c0_21 = arith.constant 0 : index
      %c0_22 = arith.constant 0 : index
      %41 = vector.load %arg6[%c0_21, %c0_22] : memref<8x1xf32, #tpu.memory_space<vmem>>, vector<8x1xf32>
      tpu.vector_store %arg6[%c0_21, %c0_22], %40 {strides = array<i32>} : memref<8x1xf32, #tpu.memory_space<vmem>>, vector<8x1xf32>,
      %c0_23 = arith.constant 0 : index
      %c0_24 = arith.constant 0 : index
      %42 = vector.load %arg5[%c0_23, %c0_24] : memref<8x1xf32, #tpu.memory_space<vmem>>, vector<8x1xf32>
      tpu.vector_store %arg5[%c0_23, %c0_24], %30 {strides = array<i32>} : memref<8x1xf32, #tpu.memory_space<vmem>>, vector<8x1xf32>,
    } else {
    }
    %9 = arith.cmpi ne, %arg0, %arg1 : i32
    %10 = arith.extui %9 : i1 to i32
    %c0_i32_5 = arith.constant 0 : i32
    %11 = arith.cmpi ne, %10, %c0_i32_5 : i32
    scf.if %11 {
      %c0_8 = arith.constant 0 : index
      %c0_9 = arith.constant 0 : index
      %15 = vector.load %arg5[%c0_8, %c0_9] : memref<8x1xf32, #tpu.memory_space<vmem>>, vector<8x1xf32>
      %cst_10 = arith.constant dense<0xFF800000> : vector<8xf32>
      %16 = vector.multi_reduction <maximumf>, %5, %cst_10 [1] : vector<8x8xf32> to vector<8xf32>
      %17 = vector.shape_cast %16 : vector<8xf32> to vector<8x1xf32>
      %18 = arith.maximumf %15, %17 : vector<8x1xf32>
      %c0_11 = arith.constant 0 : index
      %c0_12 = arith.constant 0 : index
      %19 = vector.load %arg6[%c0_11, %c0_12] : memref<8x1xf32, #tpu.memory_space<vmem>>, vector<8x1xf32>
      %20 = arith.subf %15, %18 : vector<8x1xf32>
      %21 = math.exp %20 : vector<8x1xf32>
      %22 = arith.mulf %19, %21 : vector<8x1xf32>
      %23 = vector.broadcast %18 : vector<8x1xf32> to vector<8x8xf32>
      %24 = arith.subf %5, %23 : vector<8x8xf32>
      %25 = math.exp %24 : vector<8x8xf32>
      %cst_13 = arith.constant dense<0.000000e+00> : vector<8xf32>
      %26 = vector.multi_reduction <add>, %25, %cst_13 [1] : vector<8x8xf32> to vector<8xf32>
      %27 = vector.shape_cast %26 : vector<8xf32> to vector<8x1xf32>
      %28 = arith.addf %22, %27 : vector<8x1xf32>
      %c0_14 = arith.constant 0 : index
      %c0_15 = arith.constant 0 : index
      %29 = vector.load %arg6[%c0_14, %c0_15] : memref<8x1xf32, #tpu.memory_space<vmem>>, vector<8x1xf32>
      tpu.vector_store %arg6[%c0_14, %c0_15], %28 {strides = array<i32>} : memref<8x1xf32, #tpu.memory_space<vmem>>, vector<8x1xf32>,
      %c0_16 = arith.constant 0 : index
      %c0_17 = arith.constant 0 : index
      %30 = vector.load %arg5[%c0_16, %c0_17] : memref<8x1xf32, #tpu.memory_space<vmem>>, vector<8x1xf32>
      tpu.vector_store %arg5[%c0_16, %c0_17], %18 {strides = array<i32>} : memref<8x1xf32, #tpu.memory_space<vmem>>, vector<8x1xf32>,
    } else {
    }
    %c0_i32_6 = arith.constant 0 : i32
    %12 = arith.cmpi eq, %arg1, %c0_i32_6 : i32
    %13 = arith.extui %12 : i1 to i32
    %c0_i32_7 = arith.constant 0 : i32
    %14 = arith.cmpi ne, %13, %c0_i32_7 : i32
    scf.if %14 {
      %c0_8 = arith.constant 0 : index
      %c0_9 = arith.constant 0 : index
      %15 = vector.load %arg5[%c0_8, %c0_9] : memref<8x1xf32, #tpu.memory_space<vmem>>, vector<8x1xf32>
      %c0_10 = arith.constant 0 : index
      %c0_11 = arith.constant 0 : index
      %16 = vector.load %arg6[%c0_10, %c0_11] : memref<8x1xf32, #tpu.memory_space<vmem>>, vector<8x1xf32>
      %17 = math.log %16 : vector<8x1xf32>
      %18 = arith.addf %15, %17 : vector<8x1xf32>
      %c0_12 = arith.constant 0 : index
      %c0_13 = arith.constant 0 : index
      %19 = vector.load %arg7[%c0_12, %c0_13] : memref<8x1xf32, #tpu.memory_space<vmem>>, vector<8x1xf32>
      %20 = arith.subf %18, %19 : vector<8x1xf32>
      %c0_14 = arith.constant 0 : index
      %c0_15 = arith.constant 0 : index
      %21 = vector.load %arg4[%c0_14, %c0_15] : memref<8x1xf32, #tpu.memory_space<vmem>>, vector<8x1xf32>
      tpu.vector_store %arg4[%c0_14, %c0_15], %20 {strides = array<i32>} : memref<8x1xf32, #tpu.memory_space<vmem>>, vector<8x1xf32>,
    } else {
    }
    return
  }
  func.func @transform_0(%arg0: i32, %arg1: i32) -> (i32, i32) {
    %c0_i32 = arith.constant 0 : i32
    %c0_i32_0 = arith.constant 0 : i32
    return %arg0, %c0_i32 : i32, i32
  }
  func.func @transform_1(%arg0: i32, %arg1: i32) -> (i32, i32) {
    %c0_i32 = arith.constant 0 : i32
    %c0_i32_0 = arith.constant 0 : i32
    return %arg1, %c0_i32 : i32, i32
  }
  func.func @transform_2(%arg0: i32, %arg1: i32) -> (i32, i32) {
    %c0_i32 = arith.constant 0 : i32
    %c0_i32_0 = arith.constant 0 : i32
    return %arg0, %c0_i32 : i32, i32
  }
}

</mosaic_0001>

<bundles_post_ra>
// kernel: tpu_custom_call.1
= control target key start
LH: loop header
LB: loop body
LE: loop exit
PB: predicated region body
PF: predicated region fallthrough
CT: control target
= control target key end

     0   :  { %7 = vsyncpa [#allocation6], 0  ;;  %s339_s0 = inlined_call_operand.hbm [shape: f32[8,32], index: 0, kind: input, shape index: {}]   ;;  %s340_s1 = inlined_call_operand.hbm [shape: f32[8,32], index: 1, kind: input, shape index: {}]   ;;  %s341_s2 = inlined_call_operand.vmem [shape: f32[8,1], index: 2, kind: output, shape index: {}]  }
   0x1   :  { %8 = vsyncpa [#allocation8], 0  ;;  %s283_s9 = smov [#allocation5]   ;;  %s284_s11 = smov [#allocation7]  }
   0x2   :  { %s15_s10 = sshll.u32 %s283_s9, 4  ;;  %s25_s12 = sshll.u32 %s284_s11, 4  ;;  %s16_s10 = int_to_ptr.vmem [resolvable:$true] %s15_s10  ;;  %s26_s12 = int_to_ptr.vmem [resolvable:$true] %s25_s12 }
   0x3   :  { %s235_s15 = scalar_lea.hbm %s339_s0, 128 }
   0x4   :  { %p236_p0 = scmp.ne.s32.totalorder %s339_s0, %s235_s15  ;;  %p239_p1 = scmp.lt.u32.totalorder %s235_s15, %s339_s0 }
   0x6   :  { %p241_p2 = pnand %p239_p1, %p236_p0 }
   0x8   :  { %244 = shalt.err (!%p241_p2)
}
   0x9   :  { %s245_s20 = scalar_lea.vmem %s16_s10, 128  ;;  %p250_p4 = scmp.lt.s32.totalorder %s16_s10, %s16_s10 }
   0xa   :  { %p246_p3 = scmp.ne.s32.totalorder %s16_s10, %s245_s20  ;;  %p251_p5 = scmp.lt.s32.totalorder %s245_s20, %s245_s20 }
   0xc   :  { %p252_p6 = por %p251_p5, %p250_p4 }
   0xe   :  { %p253_p7 = pnand %p252_p6, %p246_p3 }
  0x10   :  { %256 = shalt.err (!%p253_p7)
}
  0x11   :  { %18 = dma.hbm_to_vmem [thread:$0]  %s339_s0, 128, %s16_s10, [#allocation6]  }
  0x12   :  { %s257_s25 = scalar_lea.hbm %s340_s1, 128 }
  0x13   :  { %p258_p8 = scmp.ne.s32.totalorder %s340_s1, %s257_s25  ;;  %p261_p9 = scmp.lt.u32.totalorder %s257_s25, %s340_s1 }
  0x15   :  { %p263_p10 = pnand %p261_p9, %p258_p8 }
  0x17   :  { %266 = shalt.err (!%p263_p10)
}
  0x18   :  { %s267_s30 = scalar_lea.vmem %s26_s12, 128  ;;  %p272_p12 = scmp.lt.s32.totalorder %s26_s12, %s26_s12 }
  0x19   :  { %p268_p11 = scmp.ne.s32.totalorder %s26_s12, %s267_s30  ;;  %p273_p13 = scmp.lt.s32.totalorder %s267_s30, %s267_s30 }
  0x1b   :  { %p274_p0 = por %p273_p13, %p272_p12 }
  0x1d   :  { %p275_p1 = pnand %p274_p0, %p268_p11 }
  0x1f   :  { %278 = shalt.err (!%p275_p1)
}
  0x20   :  { %28 = dma.hbm_to_vmem [thread:$0]  %s340_s1, 128, %s26_s12, [#allocation8]  }
  0x21   :  { %279 = dma.done.wait [#allocation6], 128  }
  0x22   :  { %280 = vsyncadd [#allocation6], 4294967168 }
  0x23   :  { %281 = dma.done.wait [#allocation8], 128  }
  0x24   :  { %282 = vsyncadd [#allocation8], 4294967168  ;;  %vm39_vm0 = vcmask 7168   ;;  %v285_v0 = vmov 0.0   ;;  %vm286_vm1 = vmmov 0   ;;  %vm44_vm2 = vcmask 261120  }
  0x25   :  { %41 = vst.msk [vmem:[#allocation3] sm:$0xff] %vm39_vm0, %v285_v0  ;;  %216 = vmatprep.subr.mxu0 %v285_v0  ;;  %218 = vmatprep.mubr.msk.f32.mxu0 %vm286_vm1, %v285_v0  ;;  %v43_v1 = vld [vmem:[#allocation7] sm:$0xff]  ;;  %v42_v2 = vld [vmem:[#allocation5] sm:$0xff]  ;;  %v287_v5 = vmov -inf   ;;  %v133_v7 = vlaneseq  ;;  %vm140_vm4 = vcmask 64512   ;;  %v288_v14 = vmov 0  }
  0x26   :  { %217 = vmatpush3.xpose.msk.msra.mxu0 %vm44_vm2, %v43_v1  ;;  %v127_v3 = vmul.f32 %v43_v1, %v42_v2  ;;  %40 = vst.msk [vmem:[#allocation2] sm:$0xff] %vm39_vm0, %v287_v5  ;;  %227 = vset.pattern.permute.xlu1 %v288_v14 }
  0x27   :  { %v134_v8 = vshrl.u32 %v133_v7, 7  ;;  %v136_v9 = vand.u32 127, %v133_v7  ;;  %228 = vset.pattern.permute.xlu0 %v288_v14 }
  0x28   :  { %v128_v4 = vsel %vm44_vm2, %v127_v3, 0.0 }
  0x29   :  { %219 = vmatmul.mubr.msk.f32.vlgmr.msra.gmra.mrb[0].mxu0 %vm44_vm2, %v42_v2  ;;  %129 = vadd.xlane.f32.xlu0 %v128_v4  ;;  %vm137_vm3 = vcmp.eq.s32.totalorder %v134_v8, %v136_v9 }
  0x2c   :  { %v145_v26 = vld [vmem:[#allocation3] sm:$0xff] }
  0x2d   :  { %v139_v15 = vld [vmem:[#allocation2] sm:$0xff] }
  0xb6   :  { %v130_v6 = vpop.xlane.xlu0 %129 }
  0xb7   :  { %132 = vst.msk [vmem:[#allocation4] sm:$0xff] %vm39_vm0, %v130_v6 }
  0xbe   :  { %v202_v35 = vld [vmem:[#allocation4] sm:$0xff] }
  0xfc   :  { %v117_v10 = vpop.f32.mrb[0].mxu0 }
  0xfd   :  { %v220_v11 = vpop.f32.mrb[1].mxu0  ;;  %v138_v12 = vsel %vm137_vm3, %v130_v6, %v117_v10 }
  0xfe   :  { %v141_v13 = vsel %vm140_vm4, %v138_v12, -inf }
  0xff   :  { %142 = vmax.xlane.f32.xlu0 %v141_v13 }
 0x18c   :  { %v143_v16 = vpop.xlane.xlu0 %142 }
 0x18d   :  { %v144_v17 = vmax.f32 %v139_v15, %v143_v16 }
 0x18f   :  { %v146_v18 = vsub.f32 %v139_v15, %v144_v17  ;;  %163 = vst.msk [vmem:[#allocation2] sm:$0xff] %vm39_vm0, %v144_v17  ;;  %152 = vperm.xlu1 %227, %v144_v17  }
 0x191   :  { %v147_v24 = vmul.f32 1.442695, %v146_v18 }
 0x196   :  { %v197_v33 = vld [vmem:[#allocation2] sm:$0xff] }
 0x20e   :  { %v153_v19 = vpop.permute.xlu1 %152 }
 0x20f   :  { %v155_v20 = vsub.f32 %v138_v12, %v153_v19 }
 0x211   :  { %v156_v21 = vmul.f32 1.442695, %v155_v20 }
 0x213   :  { %229 = vpow2.f32 %v156_v21 }
 0x214   :  { %231 = vpow2.f32 %v147_v24 }
 0x21d   :  { %v230_v22 = vpop.eup %229 }
 0x21e   :  { %v158_v23 = vsel %vm140_vm4, %v230_v22, 0.0  ;;  %v232_v25 = vpop.eup %231 }
 0x21f   :  { %159 = vadd.xlane.f32.xlu1 %v158_v23  ;;  %v149_v27 = vmul.f32 %v232_v25, %v145_v26 }
 0x2ac   :  { %v160_v28 = vpop.xlane.xlu1 %159 }
 0x2ad   :  { %v161_v29 = vadd.f32 %v160_v28, %v149_v27 }
 0x2af   :  { %162 = vst.msk [vmem:[#allocation3] sm:$0xff] %vm39_vm0, %v161_v29 }
 0x2b6   :  { %v198_v30 = vld [vmem:[#allocation3] sm:$0xff] }
 0x2b7   :  { %233 = vlog2.f32 %v198_v30 }
 0x2c1   :  { %v234_v31 = vpop.eup %233 }
 0x2c2   :  { %v200_v32 = vmul.f32 0.6931472, %v234_v31 }
 0x2c4   :  { %v201_v34 = vadd.f32 %v200_v32, %v197_v33 }
 0x2c6   :  { %v203_v36 = vsub.f32 %v201_v34, %v202_v35 }
 0x2c8   :  { %205 = vst.msk [vmem:[%s341_s2] sm:$0xff] %vm39_vm0, %v203_v36 }
 0x2c9   :  { %210 = vsyncpa [#allocation6], 1 }
 0x2ca   :  { %211 = vsyncpa [#allocation8], 1 }

</bundles_post_ra>
